<compile_context>
chip_gen: v7x
topology: tpu7x:2x2x1
jax: 0.10.0
libtpu: 0.0.40
codegen_flags: <defaults>
</compile_context>

<pallas_src>
import functools

import jax
import jax.numpy as jnp
from jax.experimental import pallas as pl
from jax.experimental.pallas import tpu as pltpu


# ---------------------------------------------------------------------------
# Kernel
# ---------------------------------------------------------------------------
def _compl_mul_kernel(xr_ref, xi_ref, wr_ref, wi_ref, or_ref, oi_ref):
    # xr/xi : (Bblk, Cin, Pblk)   wr/wi : (Cin, Cout, Pblk)
    # out   : (Bblk, Cout, Pblk)
    ci = xr_ref.shape[1]

    xr = xr_ref[...]
    xi = xi_ref[...]
    wr = wr_ref[...]
    wi = wi_ref[...]

    acc_r = jnp.zeros(or_ref.shape, jnp.float32)
    acc_i = jnp.zeros(oi_ref.shape, jnp.float32)

    # Unrolled FMA chain over in_channels: each step only touches
    # (Bblk, Cout, Pblk)-sized operands — no O(B*Cin*Cout*P) intermediate.
    for i in range(ci):
        xr_i = xr[:, i, :][:, None, :]   # (Bblk, 1, Pblk)
        xi_i = xi[:, i, :][:, None, :]
        wr_i = wr[i, :, :][None, :, :]   # (1, Cout, Pblk)
        wi_i = wi[i, :, :][None, :, :]
        acc_r = acc_r + xr_i * wr_i - xi_i * wi_i
        acc_i = acc_i + xr_i * wi_i + xi_i * wr_i

    or_ref[...] = acc_r
    oi_ref[...] = acc_i


# ---------------------------------------------------------------------------
# Wrapper
# ---------------------------------------------------------------------------
def _largest_divisor_at_most(n, cap):
    d = 1
    for c in range(1, min(n, cap) + 1):
        if n % c == 0:
            d = c
    return d


def _pick_p_block(ppad, cap=512):
    best = 128
    c = 128
    while c <= min(ppad, cap):
        if ppad % c == 0:
            best = c
        c += 128
    return best


def compl_mul2d_fused_pallas(xc1, xc2, w1, w2):
    """Fused einsum('bixy,ioxy->boxy') over BOTH mode corners via one Pallas call.

    xc1, xc2 : (B, Ci, M, M) complex64 mode corners of x_ft
    w1,  w2  : (Ci, Co, M, M) complex64 weights
    returns  : (factor1, factor2), each (B, Co, M, M) complex64
    """
    B, Ci, M, _ = xc1.shape
    Co = w1.shape[1]
    PP = M * M
    P2 = 2 * PP
    Ppad = ((P2 + 127) // 128) * 128          # lane-dense last dim

    # Fuse the two corners along the flattened mode axis.
    xc = jnp.concatenate(
        [xc1.reshape(B, Ci, PP), xc2.reshape(B, Ci, PP)], axis=-1)
    wc = jnp.concatenate(
        [w1.reshape(Ci, Co, PP), w2.reshape(Ci, Co, PP)], axis=-1)
    if Ppad != P2:
        xc = jnp.pad(xc, ((0, 0), (0, 0), (0, Ppad - P2)))
        wc = jnp.pad(wc, ((0, 0), (0, 0), (0, Ppad - P2)))

    xr = jnp.real(xc).astype(jnp.float32)
    xi = jnp.imag(xc).astype(jnp.float32)
    wr = jnp.real(wc).astype(jnp.float32)
    wi = jnp.imag(wc).astype(jnp.float32)

    # Tiling: grid = (P tiles, B tiles); P outermost so weights stay resident
    # across the inner batch loop. Block last-two dims obey the (8,128) rule
    # (channel dims are full-extent, P blocks are multiples of 128).
    bB = _largest_divisor_at_most(B, 8)
    pP = _pick_p_block(Ppad, cap=512)
    n_p = Ppad // pP
    n_b = B // bB

    x_spec = pl.BlockSpec((bB, Ci, pP), lambda p, b: (b, 0, p))
    w_spec = pl.BlockSpec((Ci, Co, pP), lambda p, b: (0, 0, p))
    o_spec = pl.BlockSpec((bB, Co, pP), lambda p, b: (b, 0, p))

    # VMEM budget (double-buffered blocks, real+imag for every operand).
    per_block = 4 * pP * (bB * Ci + Ci * Co + bB * Co) * 2
    vmem_limit = int(min(64 * 2**20, max(4 * per_block, 32 * 2**20)))

    flops = 8 * B * Ci * Co * Ppad
    bytes_accessed = 4 * 2 * Ppad * (B * Ci + Ci * Co + B * Co)

    out_r, out_i = pl.pallas_call(
        _compl_mul_kernel,
        out_shape=(
            jax.ShapeDtypeStruct((B, Co, Ppad), jnp.float32),
            jax.ShapeDtypeStruct((B, Co, Ppad), jnp.float32),
        ),
        grid_spec=pltpu.PrefetchScalarGridSpec(
            num_scalar_prefetch=0,
            grid=(n_p, n_b),
            in_specs=[x_spec, x_spec, w_spec, w_spec],
            out_specs=[o_spec, o_spec],
        ),
        compiler_params=pltpu.CompilerParams(
            dimension_semantics=("parallel", "parallel"),
            vmem_limit_bytes=vmem_limit,
        ),
        cost_estimate=pl.CostEstimate(
            flops=flops, transcendentals=0, bytes_accessed=bytes_accessed),
    )(xr, xi, wr, wi)

    f1 = jax.lax.complex(out_r[:, :, :PP], out_i[:, :, :PP]).reshape(B, Co, M, M)
    f2 = jax.lax.complex(out_r[:, :, PP:P2], out_i[:, :, PP:P2]).reshape(B, Co, M, M)
    return f1, f2


@functools.partial(jax.jit, static_argnames=("modes",))
def spectral_conv2d_forward(x, weights1, weights2, *, modes):
    """Forward pass equivalent to SpectralConv2d.forward (PyTorch, NCHW)."""
    B, Ci, H, W = x.shape
    Co = weights1.shape[1]

    x_ft = jnp.fft.rfft2(x)                        # (B, Ci, H, W//2+1) complex64

    factor1, factor2 = compl_mul2d_fused_pallas(
        x_ft[:, :, :modes, :modes], x_ft[:, :, -modes:, :modes],
        weights1, weights2)

    out_ft = jnp.zeros((B, Co, H, W // 2 + 1), dtype=jnp.complex64)
    out_ft = out_ft.at[:, :, :modes, :modes].set(factor1)
    out_ft = out_ft.at[:, :, -modes:, :modes].set(factor2)

    return jnp.fft.irfft2(out_ft, s=(H, W))        # (B, Co, H, W) float32


# ---------------------------------------------------------------------------
# Pure-JAX reference (mirrors the PyTorch module)
# ---------------------------------------------------------------------------
def _reference_forward(x, weights1, weights2, modes):
    B, Ci, H, W = x.shape
    Co = weights1.shape[1]
    x_ft = jnp.fft.rfft2(x)
    f1 = jnp.einsum("bixy,ioxy->boxy", x_ft[:, :, :modes, :modes], weights1)
    f2 = jnp.einsum("bixy,ioxy->boxy", x_ft[:, :, -modes:, :modes], weights2)
    out_ft = jnp.zeros((B, Co, H, W // 2 + 1), dtype=jnp.complex64)
    out_ft = out_ft.at[:, :, :modes, :modes].set(f1)
    out_ft = out_ft.at[:, :, -modes:, :modes].set(f2)
    return jnp.fft.irfft2(out_ft, s=(H, W))


if __name__ == "__main__":
    batch, in_channels, out_channels, modes = 2, 4, 4, 8
    H = W = 16

    key = jax.random.PRNGKey(0)
    kx, kw1r, kw1i, kw2r, kw2i = jax.random.split(key, 5)

    x = jax.random.normal(kx, (batch, in_channels, H, W), dtype=jnp.float32)

    scale = 1.0 / (in_channels * out_channels)
    wshape = (in_channels, out_channels, modes, modes)
    weights1 = (scale * (jax.random.uniform(kw1r, wshape)
                         + 1j * jax.random.uniform(kw1i, wshape))).astype(jnp.complex64)
    weights2 = (scale * (jax.random.uniform(kw2r, wshape)
                         + 1j * jax.random.uniform(kw2i, wshape))).astype(jnp.complex64)

    out = spectral_conv2d_forward(x, weights1, weights2, modes=modes)
    out = jax.block_until_ready(out)

    ref = jax.block_until_ready(_reference_forward(x, weights1, weights2, modes))
    assert out.shape == (batch, out_channels, H, W)
    assert jnp.allclose(out, ref, atol=1e-5, rtol=1e-5)

    print("KERNEL_OK")
</pallas_src>

<mosaic_0001>
module attributes {stable_mosaic.version = 11 : i64} {
  func.func @_compl_mul_kernel(%arg0: i32, %arg1: i32, %arg2: memref<2x4x128xf32, #tpu.memory_space<vmem>>, %arg3: memref<2x4x128xf32, #tpu.memory_space<vmem>>, %arg4: memref<4x4x128xf32, #tpu.memory_space<vmem>>, %arg5: memref<4x4x128xf32, #tpu.memory_space<vmem>>, %arg6: memref<2x4x128xf32, #tpu.memory_space<vmem>>, %arg7: memref<2x4x128xf32, #tpu.memory_space<vmem>>) attributes {dimension_semantics = [#tpu.dimension_semantics<parallel>, #tpu.dimension_semantics<parallel>], iteration_bounds = array<i64: 1, 1>, scalar_prefetch = 0 : i64, scratch_operands = 0 : i64, tpu.core_type = #tpu.core_type<tc>, window_params = [{transform_indices = @transform_0, window_bounds = array<i64: 2, 4, 128>}, {transform_indices = @transform_1, window_bounds = array<i64: 2, 4, 128>}, {transform_indices = @transform_2, window_bounds = array<i64: 4, 4, 128>}, {transform_indices = @transform_3, window_bounds = array<i64: 4, 4, 128>}, {transform_indices = @transform_4, window_bounds = array<i64: 2, 4, 128>}, {transform_indices = @transform_5, window_bounds = array<i64: 2, 4, 128>}]} {
    %c0 = arith.constant 0 : index
    %c0_0 = arith.constant 0 : index
    %c0_1 = arith.constant 0 : index
    %0 = vector.load %arg2[%c0, %c0_0, %c0_1] : memref<2x4x128xf32, #tpu.memory_space<vmem>>, vector<2x4x128xf32>
    %c0_2 = arith.constant 0 : index
    %c0_3 = arith.constant 0 : index
    %c0_4 = arith.constant 0 : index
    %1 = vector.load %arg3[%c0_2, %c0_3, %c0_4] : memref<2x4x128xf32, #tpu.memory_space<vmem>>, vector<2x4x128xf32>
    %c0_5 = arith.constant 0 : index
    %c0_6 = arith.constant 0 : index
    %c0_7 = arith.constant 0 : index
    %2 = vector.load %arg4[%c0_5, %c0_6, %c0_7] : memref<4x4x128xf32, #tpu.memory_space<vmem>>, vector<4x4x128xf32>
    %c0_8 = arith.constant 0 : index
    %c0_9 = arith.constant 0 : index
    %c0_10 = arith.constant 0 : index
    %3 = vector.load %arg5[%c0_8, %c0_9, %c0_10] : memref<4x4x128xf32, #tpu.memory_space<vmem>>, vector<4x4x128xf32>
    %cst = arith.constant 0.000000e+00 : f32
    %4 = vector.broadcast %cst : f32 to vector<2x4x128xf32>
    %cst_11 = arith.constant 0.000000e+00 : f32
    %5 = vector.broadcast %cst_11 : f32 to vector<2x4x128xf32>
    %6 = vector.extract_strided_slice %0 {offsets = [0, 0, 0], sizes = [2, 1, 128], strides = [1, 1, 1]} : vector<2x4x128xf32> to vector<2x1x128xf32>
    %7 = vector.shape_cast %6 : vector<2x1x128xf32> to vector<2x128xf32>
    %8 = vector.shape_cast %7 : vector<2x128xf32> to vector<2x1x128xf32>
    %9 = vector.extract_strided_slice %1 {offsets = [0, 0, 0], sizes = [2, 1, 128], strides = [1, 1, 1]} : vector<2x4x128xf32> to vector<2x1x128xf32>
    %10 = vector.shape_cast %9 : vector<2x1x128xf32> to vector<2x128xf32>
    %11 = vector.shape_cast %10 : vector<2x128xf32> to vector<2x1x128xf32>
    %12 = vector.extract_strided_slice %2 {offsets = [0, 0, 0], sizes = [1, 4, 128], strides = [1, 1, 1]} : vector<4x4x128xf32> to vector<1x4x128xf32>
    %13 = vector.shape_cast %12 : vector<1x4x128xf32> to vector<4x128xf32>
    %14 = vector.shape_cast %13 : vector<4x128xf32> to vector<1x4x128xf32>
    %15 = vector.extract_strided_slice %3 {offsets = [0, 0, 0], sizes = [1, 4, 128], strides = [1, 1, 1]} : vector<4x4x128xf32> to vector<1x4x128xf32>
    %16 = vector.shape_cast %15 : vector<1x4x128xf32> to vector<4x128xf32>
    %17 = vector.shape_cast %16 : vector<4x128xf32> to vector<1x4x128xf32>
    %18 = vector.broadcast %8 : vector<2x1x128xf32> to vector<2x4x128xf32>
    %19 = vector.broadcast %14 : vector<1x4x128xf32> to vector<2x4x128xf32>
    %20 = arith.mulf %18, %19 : vector<2x4x128xf32>
    %21 = arith.addf %4, %20 : vector<2x4x128xf32>
    %22 = vector.broadcast %11 : vector<2x1x128xf32> to vector<2x4x128xf32>
    %23 = vector.broadcast %17 : vector<1x4x128xf32> to vector<2x4x128xf32>
    %24 = arith.mulf %22, %23 : vector<2x4x128xf32>
    %25 = arith.subf %21, %24 : vector<2x4x128xf32>
    %26 = vector.broadcast %8 : vector<2x1x128xf32> to vector<2x4x128xf32>
    %27 = vector.broadcast %17 : vector<1x4x128xf32> to vector<2x4x128xf32>
    %28 = arith.mulf %26, %27 : vector<2x4x128xf32>
    %29 = arith.addf %5, %28 : vector<2x4x128xf32>
    %30 = vector.broadcast %11 : vector<2x1x128xf32> to vector<2x4x128xf32>
    %31 = vector.broadcast %14 : vector<1x4x128xf32> to vector<2x4x128xf32>
    %32 = arith.mulf %30, %31 : vector<2x4x128xf32>
    %33 = arith.addf %29, %32 : vector<2x4x128xf32>
    %34 = vector.extract_strided_slice %0 {offsets = [0, 1, 0], sizes = [2, 1, 128], strides = [1, 1, 1]} : vector<2x4x128xf32> to vector<2x1x128xf32>
    %35 = vector.shape_cast %34 : vector<2x1x128xf32> to vector<2x128xf32>
    %36 = vector.shape_cast %35 : vector<2x128xf32> to vector<2x1x128xf32>
    %37 = vector.extract_strided_slice %1 {offsets = [0, 1, 0], sizes = [2, 1, 128], strides = [1, 1, 1]} : vector<2x4x128xf32> to vector<2x1x128xf32>
    %38 = vector.shape_cast %37 : vector<2x1x128xf32> to vector<2x128xf32>
    %39 = vector.shape_cast %38 : vector<2x128xf32> to vector<2x1x128xf32>
    %40 = vector.extract_strided_slice %2 {offsets = [1, 0, 0], sizes = [1, 4, 128], strides = [1, 1, 1]} : vector<4x4x128xf32> to vector<1x4x128xf32>
    %41 = vector.shape_cast %40 : vector<1x4x128xf32> to vector<4x128xf32>
    %42 = vector.shape_cast %41 : vector<4x128xf32> to vector<1x4x128xf32>
    %43 = vector.extract_strided_slice %3 {offsets = [1, 0, 0], sizes = [1, 4, 128], strides = [1, 1, 1]} : vector<4x4x128xf32> to vector<1x4x128xf32>
    %44 = vector.shape_cast %43 : vector<1x4x128xf32> to vector<4x128xf32>
    %45 = vector.shape_cast %44 : vector<4x128xf32> to vector<1x4x128xf32>
    %46 = vector.broadcast %36 : vector<2x1x128xf32> to vector<2x4x128xf32>
    %47 = vector.broadcast %42 : vector<1x4x128xf32> to vector<2x4x128xf32>
    %48 = arith.mulf %46, %47 : vector<2x4x128xf32>
    %49 = arith.addf %25, %48 : vector<2x4x128xf32>
    %50 = vector.broadcast %39 : vector<2x1x128xf32> to vector<2x4x128xf32>
    %51 = vector.broadcast %45 : vector<1x4x128xf32> to vector<2x4x128xf32>
    %52 = arith.mulf %50, %51 : vector<2x4x128xf32>
    %53 = arith.subf %49, %52 : vector<2x4x128xf32>
    %54 = vector.broadcast %36 : vector<2x1x128xf32> to vector<2x4x128xf32>
    %55 = vector.broadcast %45 : vector<1x4x128xf32> to vector<2x4x128xf32>
    %56 = arith.mulf %54, %55 : vector<2x4x128xf32>
    %57 = arith.addf %33, %56 : vector<2x4x128xf32>
    %58 = vector.broadcast %39 : vector<2x1x128xf32> to vector<2x4x128xf32>
    %59 = vector.broadcast %42 : vector<1x4x128xf32> to vector<2x4x128xf32>
    %60 = arith.mulf %58, %59 : vector<2x4x128xf32>
    %61 = arith.addf %57, %60 : vector<2x4x128xf32>
    %62 = vector.extract_strided_slice %0 {offsets = [0, 2, 0], sizes = [2, 1, 128], strides = [1, 1, 1]} : vector<2x4x128xf32> to vector<2x1x128xf32>
    %63 = vector.shape_cast %62 : vector<2x1x128xf32> to vector<2x128xf32>
    %64 = vector.shape_cast %63 : vector<2x128xf32> to vector<2x1x128xf32>
    %65 = vector.extract_strided_slice %1 {offsets = [0, 2, 0], sizes = [2, 1, 128], strides = [1, 1, 1]} : vector<2x4x128xf32> to vector<2x1x128xf32>
    %66 = vector.shape_cast %65 : vector<2x1x128xf32> to vector<2x128xf32>
    %67 = vector.shape_cast %66 : vector<2x128xf32> to vector<2x1x128xf32>
    %68 = vector.extract_strided_slice %2 {offsets = [2, 0, 0], sizes = [1, 4, 128], strides = [1, 1, 1]} : vector<4x4x128xf32> to vector<1x4x128xf32>
    %69 = vector.shape_cast %68 : vector<1x4x128xf32> to vector<4x128xf32>
    %70 = vector.shape_cast %69 : vector<4x128xf32> to vector<1x4x128xf32>
    %71 = vector.extract_strided_slice %3 {offsets = [2, 0, 0], sizes = [1, 4, 128], strides = [1, 1, 1]} : vector<4x4x128xf32> to vector<1x4x128xf32>
    %72 = vector.shape_cast %71 : vector<1x4x128xf32> to vector<4x128xf32>
    %73 = vector.shape_cast %72 : vector<4x128xf32> to vector<1x4x128xf32>
    %74 = vector.broadcast %64 : vector<2x1x128xf32> to vector<2x4x128xf32>
    %75 = vector.broadcast %70 : vector<1x4x128xf32> to vector<2x4x128xf32>
    %76 = arith.mulf %74, %75 : vector<2x4x128xf32>
    %77 = arith.addf %53, %76 : vector<2x4x128xf32>
    %78 = vector.broadcast %67 : vector<2x1x128xf32> to vector<2x4x128xf32>
    %79 = vector.broadcast %73 : vector<1x4x128xf32> to vector<2x4x128xf32>
    %80 = arith.mulf %78, %79 : vector<2x4x128xf32>
    %81 = arith.subf %77, %80 : vector<2x4x128xf32>
    %82 = vector.broadcast %64 : vector<2x1x128xf32> to vector<2x4x128xf32>
    %83 = vector.broadcast %73 : vector<1x4x128xf32> to vector<2x4x128xf32>
    %84 = arith.mulf %82, %83 : vector<2x4x128xf32>
    %85 = arith.addf %61, %84 : vector<2x4x128xf32>
    %86 = vector.broadcast %67 : vector<2x1x128xf32> to vector<2x4x128xf32>
    %87 = vector.broadcast %70 : vector<1x4x128xf32> to vector<2x4x128xf32>
    %88 = arith.mulf %86, %87 : vector<2x4x128xf32>
    %89 = arith.addf %85, %88 : vector<2x4x128xf32>
    %90 = vector.extract_strided_slice %0 {offsets = [0, 3, 0], sizes = [2, 1, 128], strides = [1, 1, 1]} : vector<2x4x128xf32> to vector<2x1x128xf32>
    %91 = vector.shape_cast %90 : vector<2x1x128xf32> to vector<2x128xf32>
    %92 = vector.shape_cast %91 : vector<2x128xf32> to vector<2x1x128xf32>
    %93 = vector.extract_strided_slice %1 {offsets = [0, 3, 0], sizes = [2, 1, 128], strides = [1, 1, 1]} : vector<2x4x128xf32> to vector<2x1x128xf32>
    %94 = vector.shape_cast %93 : vector<2x1x128xf32> to vector<2x128xf32>
    %95 = vector.shape_cast %94 : vector<2x128xf32> to vector<2x1x128xf32>
    %96 = vector.extract_strided_slice %2 {offsets = [3, 0, 0], sizes = [1, 4, 128], strides = [1, 1, 1]} : vector<4x4x128xf32> to vector<1x4x128xf32>
    %97 = vector.shape_cast %96 : vector<1x4x128xf32> to vector<4x128xf32>
    %98 = vector.shape_cast %97 : vector<4x128xf32> to vector<1x4x128xf32>
    %99 = vector.extract_strided_slice %3 {offsets = [3, 0, 0], sizes = [1, 4, 128], strides = [1, 1, 1]} : vector<4x4x128xf32> to vector<1x4x128xf32>
    %100 = vector.shape_cast %99 : vector<1x4x128xf32> to vector<4x128xf32>
    %101 = vector.shape_cast %100 : vector<4x128xf32> to vector<1x4x128xf32>
    %102 = vector.broadcast %92 : vector<2x1x128xf32> to vector<2x4x128xf32>
    %103 = vector.broadcast %98 : vector<1x4x128xf32> to vector<2x4x128xf32>
    %104 = arith.mulf %102, %103 : vector<2x4x128xf32>
    %105 = arith.addf %81, %104 : vector<2x4x128xf32>
    %106 = vector.broadcast %95 : vector<2x1x128xf32> to vector<2x4x128xf32>
    %107 = vector.broadcast %101 : vector<1x4x128xf32> to vector<2x4x128xf32>
    %108 = arith.mulf %106, %107 : vector<2x4x128xf32>
    %109 = arith.subf %105, %108 : vector<2x4x128xf32>
    %110 = vector.broadcast %92 : vector<2x1x128xf32> to vector<2x4x128xf32>
    %111 = vector.broadcast %101 : vector<1x4x128xf32> to vector<2x4x128xf32>
    %112 = arith.mulf %110, %111 : vector<2x4x128xf32>
    %113 = arith.addf %89, %112 : vector<2x4x128xf32>
    %114 = vector.broadcast %95 : vector<2x1x128xf32> to vector<2x4x128xf32>
    %115 = vector.broadcast %98 : vector<1x4x128xf32> to vector<2x4x128xf32>
    %116 = arith.mulf %114, %115 : vector<2x4x128xf32>
    %117 = arith.addf %113, %116 : vector<2x4x128xf32>
    %c0_12 = arith.constant 0 : index
    %c0_13 = arith.constant 0 : index
    %c0_14 = arith.constant 0 : index
    %118 = vector.load %arg6[%c0_12, %c0_13, %c0_14] : memref<2x4x128xf32, #tpu.memory_space<vmem>>, vector<2x4x128xf32>
    tpu.vector_store %arg6[%c0_12, %c0_13, %c0_14], %109 {strides = array<i32>} : memref<2x4x128xf32, #tpu.memory_space<vmem>>, vector<2x4x128xf32>,
    %c0_15 = arith.constant 0 : index
    %c0_16 = arith.constant 0 : index
    %c0_17 = arith.constant 0 : index
    %119 = vector.load %arg7[%c0_15, %c0_16, %c0_17] : memref<2x4x128xf32, #tpu.memory_space<vmem>>, vector<2x4x128xf32>
    tpu.vector_store %arg7[%c0_15, %c0_16, %c0_17], %117 {strides = array<i32>} : memref<2x4x128xf32, #tpu.memory_space<vmem>>, vector<2x4x128xf32>,
    return
  }
  func.func @transform_0(%arg0: i32, %arg1: i32) -> (i32, i32, i32) {
    %c0_i32 = arith.constant 0 : i32
    %c0_i32_0 = arith.constant 0 : i32
    return %arg1, %c0_i32, %arg0 : i32, i32, i32
  }
  func.func @transform_1(%arg0: i32, %arg1: i32) -> (i32, i32, i32) {
    %c0_i32 = arith.constant 0 : i32
    %c0_i32_0 = arith.constant 0 : i32
    return %arg1, %c0_i32, %arg0 : i32, i32, i32
  }
  func.func @transform_2(%arg0: i32, %arg1: i32) -> (i32, i32, i32) {
    %c0_i32 = arith.constant 0 : i32
    %c0_i32_0 = arith.constant 0 : i32
    %c0_i32_1 = arith.constant 0 : i32
    return %c0_i32, %c0_i32_0, %arg0 : i32, i32, i32
  }
  func.func @transform_3(%arg0: i32, %arg1: i32) -> (i32, i32, i32) {
    %c0_i32 = arith.constant 0 : i32
    %c0_i32_0 = arith.constant 0 : i32
    %c0_i32_1 = arith.constant 0 : i32
    return %c0_i32, %c0_i32_0, %arg0 : i32, i32, i32
  }
  func.func @transform_4(%arg0: i32, %arg1: i32) -> (i32, i32, i32) {
    %c0_i32 = arith.constant 0 : i32
    %c0_i32_0 = arith.constant 0 : i32
    return %arg1, %c0_i32, %arg0 : i32, i32, i32
  }
  func.func @transform_5(%arg0: i32, %arg1: i32) -> (i32, i32, i32) {
    %c0_i32 = arith.constant 0 : i32
    %c0_i32_0 = arith.constant 0 : i32
    return %arg1, %c0_i32, %arg0 : i32, i32, i32
  }
}

</mosaic_0001>

<bundles_post_ra>
// kernel: custom-call.1
= control target key start
LH: loop header
LB: loop body
LE: loop exit
PB: predicated region body
PF: predicated region fallthrough
CT: control target
= control target key end

     0   :  { %s59_s0 = inlined_call_operand.hbm [shape: c64[4,4,8,8], index: 0, kind: input, shape index: {}]   ;;  %s60_s1 = inlined_call_operand.vmem [shape: f32[4,4,8,8], index: 1, kind: output, shape index: {}]  }
   0x1   :  { %s2_s8 = scalar_lea.hbm %s59_s0, 2048 }
   0x2   :  { %3 = vsyncpa [#allocation0], 0  ;;  %s4_s11 = sshll.u32 %s60_s1, 4  ;;  %s34_s14 = scalar_lea.hbm %s59_s0, 4096  ;;  %s5_s11 = int_to_ptr.vmem [resolvable:$true] %s4_s11 }
   0x3   :  { %p11_p0 = scmp.ne.s32.totalorder %s2_s8, %s34_s14  ;;  %p13_p1 = scmp.lt.u32.totalorder %s2_s8, %s59_s0 }
   0x4   :  { %p14_p2 = scmp.lt.u32.totalorder %s34_s14, %s34_s14  ;;  %p16_p4 = scmp.lt.u32.totalorder %s34_s14, %s2_s8 }
   0x6   :  { %p15_p3 = por %p14_p2, %p13_p1 }
   0x8   :  { %p17_p5 = por %p16_p4, %p15_p3 }
   0xa   :  { %p18_p6 = pnand %p17_p5, %p11_p0 }
   0xc   :  { %21 = shalt.err (!%p18_p6)  }
   0xd   :  { %s22_s17 = scalar_lea.vmem %s5_s11, 2048  ;;  %p27_p8 = scmp.lt.s32.totalorder %s5_s11, %s5_s11 }
   0xe   :  { %p23_p7 = scmp.ne.s32.totalorder %s5_s11, %s22_s17  ;;  %p28_p9 = scmp.lt.s32.totalorder %s22_s17, %s22_s17 }
  0x10   :  { %p29_p10 = por %p28_p9, %p27_p8 }
  0x12   :  { %p30_p11 = pnand %p29_p10, %p23_p7 }
  0x14   :  { %33 = shalt.err (!%p30_p11)  }
  0x15   :  { %7 = dma.hbm_to_vmem [thread:$0]  %s2_s8, 2048, %s5_s11, [#allocation0] }
  0x16   :  { %35 = dma.done.wait [#allocation0], 2048  }
  0x17   :  { %36 = vsyncadd [#allocation0], 4294965248 }
  0x18   :  { %9 = vsyncpa [#allocation0], 1 }

// kernel: custom-call
= control target key start
LH: loop header
LB: loop body
LE: loop exit
PB: predicated region body
PF: predicated region fallthrough
CT: control target
= control target key end

     0   :  { %2 = vsyncpa [#allocation0], 0  ;;  %s61_s0 = inlined_call_operand.hbm [shape: c64[4,4,8,8], index: 0, kind: input, shape index: {}]   ;;  %s62_s1 = inlined_call_operand.vmem [shape: f32[4,4,8,8], index: 1, kind: output, shape index: {}]  }
   0x1   :  { %s3_s8 = sshll.u32 %s62_s1, 4  ;;  %s9_s11 = scalar_lea.hbm %s61_s0, 2048  ;;  %s4_s8 = int_to_ptr.vmem [resolvable:$true] %s3_s8 }
   0x2   :  { %p10_p0 = scmp.ne.s32.totalorder %s61_s0, %s9_s11  ;;  %s11_s16 = scalar_lea.hbm %s61_s0, 4096 }
   0x3   :  { %p12_p1 = scmp.lt.u32.totalorder %s11_s16, %s9_s11  ;;  %p13_p2 = scmp.lt.u32.totalorder %s9_s11, %s61_s0 }
   0x5   :  { %p14_p3 = por %p13_p2, %p12_p1 }
   0x7   :  { %p15_p4 = pnand %p14_p3, %p10_p0 }
   0x9   :  { %18 = shalt.err (!%p15_p4)  }
   0xa   :  { %s19_s1 = scalar_lea.vmem %s4_s8, 2048  ;;  %p24_p6 = scmp.lt.s32.totalorder %s4_s8, %s4_s8 }
   0xb   :  { %p20_p5 = scmp.ne.s32.totalorder %s4_s8, %s19_s1  ;;  %p25_p7 = scmp.lt.s32.totalorder %s19_s1, %s19_s1 }
   0xd   :  { %p26_p8 = por %p25_p7, %p24_p6 }
   0xf   :  { %p27_p9 = pnand %p26_p8, %p20_p5 }
  0x11   :  { %30 = shalt.err (!%p27_p9)  }
  0x12   :  { %6 = dma.hbm_to_vmem [thread:$0]  %s61_s0, 2048, %s4_s8, [#allocation0] }
  0x13   :  { %31 = dma.done.wait [#allocation0], 2048  }
  0x14   :  { %32 = vsyncadd [#allocation0], 4294965248 }
  0x15   :  { %8 = vsyncpa [#allocation0], 1 }

// kernel: spectral_conv2d_forward.1
= control target key start
LH: loop header
LB: loop body
LE: loop exit
PB: predicated region body
PF: predicated region fallthrough
CT: control target
= control target key end

     0   :  { %v31_v0 = vlaneseq  ;;  %s261_s0 = inlined_call_operand.vmem [shape: f32[2,4,128], index: 0, kind: input, shape index: {}]   ;;  %s262_s1 = inlined_call_operand.vmem [shape: f32[2,4,128], index: 1, kind: input, shape index: {}]   ;;  %s263_s2 = inlined_call_operand.vmem [shape: f32[4,4,128], index: 2, kind: input, shape index: {}]   ;;  %s264_s3 = inlined_call_operand.vmem [shape: f32[4,4,128], index: 3, kind: input, shape index: {}]   ;;  %s265_s4 = inlined_call_operand.vmem [shape: f32[2,4,128], index: 4, kind: output, shape index: {0}]   ;;  %s266_s5 = inlined_call_operand.vmem [shape: f32[2,4,128], index: 5, kind: output, shape index: {1}]  }
   0x1   :  { %v19_v2 = vld [vmem:[%s261_s0] sm:$0xf]  ;;  %v24_v8 = vld [vmem:[%s263_s2 + $0x4] sm:$0xf]  ;;  %v225_v18 = vld [vmem:[%s263_s2 + $0x8] sm:$0xf] }
   0x2   :  { %v32_v1 = vshrl.u32 %v31_v0, 7  ;;  %v21_v3 = vld [vmem:[%s262_s1] sm:$0xf]  ;;  %v20_v16 = vld [vmem:[%s261_s0 + $0x4] sm:$0xf] }
   0x3   :  { %v23_v4 = vld [vmem:[%s263_s2] sm:$0xf]  ;;  %v22_v17 = vld [vmem:[%s262_s1 + $0x4] sm:$0xf]  ;;  %v233_v27 = vld [vmem:[%s263_s2 + $0xc] sm:$0xf] }
   0x4   :  { %v33_v5 = vsub.s32 0, %v32_v1  ;;  %v65_v6 = vsub.s32 1, %v32_v1  ;;  %v97_v7 = vsub.s32 2, %v32_v1  ;;  %v27_v9 = vld [vmem:[%s264_s3] sm:$0xf]  ;;  %v129_v10 = vsub.s32 3, %v32_v1 }
   0x5   :  { %v28_v19 = vld [vmem:[%s264_s3 + $0x4] sm:$0xf]  ;;  %v29_v36 = vld [vmem:[%s264_s3 + $0x8] sm:$0xf]  ;;  %v30_v43 = vld [vmem:[%s264_s3 + $0xc] sm:$0xf] }
   0x6   :  { %v34_v11 = vrot.slane %v19_v2, %v33_v5  ;;  %v46_v12 = vrot.slane %v21_v3, %v33_v5  ;;  %v66_v13 = vrot.slane %v19_v2, %v65_v6  ;;  %v78_v14 = vrot.slane %v21_v3, %v65_v6 }
   0x7   :  { %v98_v15 = vrot.slane %v19_v2, %v97_v7  ;;  %v110_v24 = vrot.slane %v21_v3, %v97_v7  ;;  %v130_v25 = vrot.slane %v19_v2, %v129_v10  ;;  %v142_v26 = vrot.slane %v21_v3, %v129_v10 }
   0x8   :  { %v39_v20 = vmul.f32 %v34_v11, %v23_v4  ;;  %v51_v21 = vmul.f32 %v46_v12, %v27_v9  ;;  %v71_v22 = vmul.f32 %v66_v13, %v24_v8  ;;  %v83_v23 = vmul.f32 %v78_v14, %v28_v19 }
   0x9   :  { %v38_v29 = vrot.slane %v20_v16, %v33_v5  ;;  %v50_v30 = vrot.slane %v22_v17, %v33_v5  ;;  %v70_v31 = vrot.slane %v20_v16, %v65_v6  ;;  %v103_v32 = vmul.f32 %v98_v15, %v225_v18 }
   0xa   :  { %v53_v28 = vsub.f32 %v39_v20, %v51_v21  ;;  %v82_v33 = vrot.slane %v22_v17, %v65_v6  ;;  %v102_v34 = vrot.slane %v20_v16, %v97_v7  ;;  %v114_v35 = vrot.slane %v22_v17, %v97_v7 }
   0xb   :  { %v40_v38 = vmul.f32 %v38_v29, %v23_v4  ;;  %v52_v39 = vmul.f32 %v50_v30, %v27_v9  ;;  %v72_v40 = vmul.f32 %v70_v31, %v24_v8  ;;  %v115_v41 = vmul.f32 %v110_v24, %v29_v36 }
   0xc   :  { %v73_v37 = vadd.f32 %v71_v22, %v53_v28  ;;  %v135_v42 = vmul.f32 %v130_v25, %v233_v27  ;;  %v84_v46 = vmul.f32 %v82_v33, %v28_v19  ;;  %v55_v47 = vmul.f32 %v34_v11, %v27_v9 }
   0xd   :  { %v54_v45 = vsub.f32 %v40_v38, %v52_v39  ;;  %v147_v48 = vmul.f32 %v142_v26, %v30_v43  ;;  %v134_v49 = vrot.slane %v20_v16, %v129_v10  ;;  %v59_v50 = vmul.f32 %v46_v12, %v23_v4 }
   0xe   :  { %v85_v44 = vsub.f32 %v73_v37, %v83_v23  ;;  %v87_v51 = vmul.f32 %v66_v13, %v28_v19  ;;  %v104_v54 = vmul.f32 %v102_v34, %v225_v18  ;;  %v116_v55 = vmul.f32 %v114_v35, %v29_v36 }
   0xf   :  { %v74_v53 = vadd.f32 %v72_v40, %v54_v45  ;;  %v146_v56 = vrot.slane %v22_v17, %v129_v10  ;;  %v61_v57 = vadd.f32 %v59_v50, %v55_v47  ;;  %v91_v58 = vmul.f32 %v78_v14, %v24_v8 }
  0x10   :  { %v105_v52 = vadd.f32 %v103_v32, %v85_v44  ;;  %v56_v59 = vmul.f32 %v38_v29, %v27_v9  ;;  %v60_v62 = vmul.f32 %v50_v30, %v23_v4  ;;  %v88_v63 = vmul.f32 %v70_v31, %v28_v19 }
  0x11   :  { %v86_v61 = vsub.f32 %v74_v53, %v84_v46  ;;  %v136_v0 = vmul.f32 %v134_v49, %v233_v27  ;;  %v89_v1 = vadd.f32 %v87_v51, %v61_v57  ;;  %v119_v2 = vmul.f32 %v98_v15, %v29_v36 }
  0x12   :  { %v117_v60 = vsub.f32 %v105_v52, %v115_v41  ;;  %v62_v6 = vadd.f32 %v60_v62, %v56_v59  ;;  %v92_v7 = vmul.f32 %v82_v33, %v24_v8  ;;  %v148_v11 = vmul.f32 %v146_v56, %v30_v43 }
  0x13   :  { %v106_v5 = vadd.f32 %v104_v54, %v86_v61  ;;  %v93_v12 = vadd.f32 %v91_v58, %v89_v1  ;;  %v123_v13 = vmul.f32 %v110_v24, %v225_v18  ;;  %v120_v9 = vmul.f32 %v102_v34, %v29_v36 }
  0x14   :  { %v137_v3 = vadd.f32 %v135_v42, %v117_v60  ;;  %v90_v14 = vadd.f32 %v88_v63, %v62_v6  ;;  %v151_v20 = vmul.f32 %v130_v25, %v30_v43  ;;  %v124_v19 = vmul.f32 %v114_v35, %v225_v18 }
  0x15   :  { %v118_v16 = vsub.f32 %v106_v5, %v116_v55  ;;  %v121_v17 = vadd.f32 %v119_v2, %v93_v12  ;;  %v155_v8 = vmul.f32 %v142_v26, %v233_v27  ;;  %v152_v24 = vmul.f32 %v134_v49, %v30_v43 }
  0x16   :  { %v149_v10 = vsub.f32 %v137_v3, %v147_v48  ;;  %v94_v15 = vadd.f32 %v92_v7, %v90_v14  ;;  %v156_v29 = vmul.f32 %v146_v56, %v233_v27 }
  0x17   :  { %v138_v4 = vadd.f32 %v136_v0, %v118_v16  ;;  %v125_v21 = vadd.f32 %v123_v13, %v121_v17 }
  0x18   :  { %159 = vst [vmem:[%s265_s4] sm:$0xf] %v149_v10  ;;  %v122_v23 = vadd.f32 %v120_v9, %v94_v15 }
  0x19   :  { %v150_v22 = vsub.f32 %v138_v4, %v148_v11  ;;  %v153_v28 = vadd.f32 %v151_v20, %v125_v21 }
  0x1a   :  { %v126_v25 = vadd.f32 %v124_v19, %v122_v23 }
  0x1b   :  { %160 = vst [vmem:[%s265_s4 + $0x4] sm:$0xf] %v150_v22  ;;  %v157_v30 = vadd.f32 %v155_v8, %v153_v28 }
  0x1c   :  { %v154_v31 = vadd.f32 %v152_v24, %v126_v25 }
  0x1d   :  { %161 = vst [vmem:[%s266_s5] sm:$0xf] %v157_v30 }
  0x1e   :  { %v158_v18 = vadd.f32 %v156_v29, %v154_v31 }
  0x20   :  { %162 = vst [vmem:[%s266_s5 + $0x4] sm:$0xf] %v158_v18 }

// kernel: reverse.1
= control target key start
LH: loop header
LB: loop body
LE: loop exit
PB: predicated region body
PF: predicated region fallthrough
CT: control target
= control target key end

     0   :  { %v71_v3 = vlaneseq  ;;  %v64_v9 = vld [vmem:[#allocation0 + $0x7] ss:$-1 sm:$0xff]  ;;  %v78_v12 = vld [vmem:[#allocation0 + $0x17] ss:$-1 sm:$0xff]  ;;  %s329_s0 = inlined_call_operand.vmem [shape: f32[2,4,16,7], index: 0, kind: input, shape index: {}]   ;;  %s330_s1 = inlined_call_operand.vmem [shape: f32[2,4,16,7], index: 1, kind: output, shape index: {}]  }
   0x1   :  { %v44_v0 = vld [vmem:[%s329_s0] sm:$0xff]  ;;  %v46_v1 = vld [vmem:[%s329_s0 + $0x8] sm:$0xff]  ;;  %v48_v2 = vld [vmem:[%s329_s0 + $0x10] sm:$0xff]  ;;  %v65_v10 = vrot.slane %v64_v9, 1  ;;  %v79_v14 = vrot.slane %v78_v12, 1 }
   0x2   :  { %45 = vst [vmem:[#allocation0 + $0x8] sm:$0xff] %v44_v0  ;;  %47 = vst [vmem:[#allocation0 + $0x18] sm:$0xff] %v46_v1  ;;  %v50_v4 = vld [vmem:[%s329_s0 + $0x18] sm:$0xff]  ;;  %v52_v5 = vld [vmem:[%s329_s0 + $0x20] sm:$0xff]  ;;  %v72_v11 = vshrl.u32 %v71_v3, 7 }
   0x3   :  { %49 = vst [vmem:[#allocation0 + $0x28] sm:$0xff] %v48_v2  ;;  %v54_v6 = vld [vmem:[%s329_s0 + $0x28] sm:$0xff]  ;;  %51 = vst [vmem:[#allocation0 + $0x38] sm:$0xff] %v50_v4  ;;  %v56_v7 = vld [vmem:[%s329_s0 + $0x30] sm:$0xff] }
   0x4   :  { %53 = vst [vmem:[#allocation0 + $0x48] sm:$0xff] %v52_v5  ;;  %55 = vst [vmem:[#allocation0 + $0x58] sm:$0xff] %v54_v6  ;;  %v58_v8 = vld [vmem:[%s329_s0 + $0x38] sm:$0xff]  ;;  %v92_v13 = vld [vmem:[#allocation0 + $0x27] ss:$-1 sm:$0xff]  ;;  %vm73_vm0 = vcmp.lt.s32.totalorder %v72_v11, 7 }
   0x5   :  { %57 = vst [vmem:[#allocation0 + $0x68] sm:$0xff] %v56_v7  ;;  %59 = vst [vmem:[#allocation0 + $0x78] sm:$0xff] %v58_v8  ;;  %v93_v15 = vrot.slane %v92_v13, 1  ;;  %v106_v16 = vld [vmem:[#allocation0 + $0x37] ss:$-1 sm:$0xff] }
   0x6   :  { %66 = vst [vmem:[#allocation1] sm:$0xff] %v65_v10  ;;  %v107_v17 = vrot.slane %v106_v16, 1  ;;  %v120_v18 = vld [vmem:[#allocation0 + $0x47] ss:$-1 sm:$0xff]  ;;  %v134_v19 = vld [vmem:[#allocation0 + $0x57] ss:$-1 sm:$0xff] }
   0x7   :  { %80 = vst [vmem:[#allocation1 + $0x8] sm:$0xff] %v79_v14  ;;  %94 = vst [vmem:[#allocation1 + $0x10] sm:$0xff] %v93_v15  ;;  %v121_v20 = vrot.slane %v120_v18, 1  ;;  %v135_v21 = vrot.slane %v134_v19, 1  ;;  %v148_v22 = vld [vmem:[#allocation0 + $0x67] ss:$-1 sm:$0xff] }
   0x8   :  { %v162_v23 = vld [vmem:[#allocation0 + $0x77] ss:$-1 sm:$0xff]  ;;  %108 = vst [vmem:[#allocation1 + $0x18] sm:$0xff] %v107_v17  ;;  %v149_v24 = vrot.slane %v148_v22, 1 }
   0x9   :  { %v163_v25 = vrot.slane %v162_v23, 1  ;;  %v69_v26 = vld [vmem:[#allocation0 + $0xf] ss:$-1 sm:$0xff]  ;;  %v83_v27 = vld [vmem:[#allocation0 + $0x1f] ss:$-1 sm:$0xff]  ;;  %122 = vst [vmem:[#allocation1 + $0x20] sm:$0xff] %v121_v20 }
   0xa   :  { %v97_v28 = vld [vmem:[#allocation0 + $0x2f] ss:$-1 sm:$0xff]  ;;  %136 = vst [vmem:[#allocation1 + $0x28] sm:$0xff] %v135_v21  ;;  %v70_v29 = vrot.slane %v69_v26, 1  ;;  %v84_v30 = vrot.slane %v83_v27, 1  ;;  %150 = vst [vmem:[#allocation1 + $0x30] sm:$0xff] %v149_v24 }
   0xb   :  { %v98_v31 = vrot.slane %v97_v28, 1  ;;  %v111_v32 = vld [vmem:[#allocation0 + $0x3f] ss:$-1 sm:$0xff]  ;;  %164 = vst [vmem:[#allocation1 + $0x38] sm:$0xff] %v163_v25  ;;  %v125_v34 = vld [vmem:[#allocation0 + $0x4f] ss:$-1 sm:$0xff] }
   0xc   :  { %v112_v33 = vrot.slane %v111_v32, 1  ;;  %v139_v35 = vld [vmem:[#allocation0 + $0x5f] ss:$-1 sm:$0xff]  ;;  %74 = vst.msk [vmem:[#allocation1] sm:$0xff] %vm73_vm0, %v70_v29  ;;  %88 = vst.msk [vmem:[#allocation1 + $0x8] sm:$0xff] %vm73_vm0, %v84_v30  ;;  %v126_v36 = vrot.slane %v125_v34, 1 }
   0xd   :  { %102 = vst.msk [vmem:[#allocation1 + $0x10] sm:$0xff] %vm73_vm0, %v98_v31  ;;  %v140_v37 = vrot.slane %v139_v35, 1  ;;  %v153_v38 = vld [vmem:[#allocation0 + $0x6f] ss:$-1 sm:$0xff]  ;;  %v167_v39 = vld [vmem:[#allocation0 + $0x7f] ss:$-1 sm:$0xff] }
   0xe   :  { %116 = vst.msk [vmem:[#allocation1 + $0x18] sm:$0xff] %vm73_vm0, %v112_v33  ;;  %v154_v40 = vrot.slane %v153_v38, 1  ;;  %v168_v41 = vrot.slane %v167_v39, 1  ;;  %130 = vst.msk [vmem:[#allocation1 + $0x20] sm:$0xff] %vm73_vm0, %v126_v36 }
   0xf   :  { %144 = vst.msk [vmem:[#allocation1 + $0x28] sm:$0xff] %vm73_vm0, %v140_v37 }
  0x10   :  { %158 = vst.msk [vmem:[#allocation1 + $0x30] sm:$0xff] %vm73_vm0, %v154_v40  ;;  %172 = vst.msk [vmem:[#allocation1 + $0x38] sm:$0xff] %vm73_vm0, %v168_v41 }
  0x13   :  { %v214_v42 = vld [vmem:[#allocation1] sm:$0xff]  ;;  %v216_v43 = vld [vmem:[#allocation1 + $0x8] sm:$0xff] }
  0x14   :  { %v218_v44 = vld [vmem:[#allocation1 + $0x10] sm:$0xff]  ;;  %215 = vst [vmem:[%s330_s1] sm:$0xff] %v214_v42  ;;  %217 = vst [vmem:[%s330_s1 + $0x8] sm:$0xff] %v216_v43 }
  0x15   :  { %219 = vst [vmem:[%s330_s1 + $0x10] sm:$0xff] %v218_v44  ;;  %v220_v45 = vld [vmem:[#allocation1 + $0x18] sm:$0xff]  ;;  %v222_v46 = vld [vmem:[#allocation1 + $0x20] sm:$0xff] }
  0x16   :  { %221 = vst [vmem:[%s330_s1 + $0x18] sm:$0xff] %v220_v45  ;;  %v224_v47 = vld [vmem:[#allocation1 + $0x28] sm:$0xff]  ;;  %223 = vst [vmem:[%s330_s1 + $0x20] sm:$0xff] %v222_v46 }
  0x17   :  { %225 = vst [vmem:[%s330_s1 + $0x28] sm:$0xff] %v224_v47  ;;  %v226_v48 = vld [vmem:[#allocation1 + $0x30] sm:$0xff]  ;;  %v228_v49 = vld [vmem:[#allocation1 + $0x38] sm:$0xff] }
  0x18   :  { %227 = vst [vmem:[%s330_s1 + $0x30] sm:$0xff] %v226_v48  ;;  %229 = vst [vmem:[%s330_s1 + $0x38] sm:$0xff] %v228_v49 }

</bundles_post_ra>
